<compile_context>
chip_gen: v6e
topology: v6e:2x2x1
jax: 0.10.0
libtpu: 0.0.40
codegen_flags: <defaults>
</compile_context>

<pallas_src>
import functools

import jax
import jax.numpy as jnp
from jax.experimental import pallas as pl
from jax.experimental.pallas import tpu as pltpu


# --------------------------------------------------------------------------- #
# Kernels
# --------------------------------------------------------------------------- #

def _fused_kernel(x_ref, o_ref, *, gc, grp, c, f, cc, hw, eps):
    """Single-call path: whole (N, C, HW) array resident in VMEM.

    Computes the per-group stddev stats and writes the concatenated output in
    one pass, so x is read from HBM exactly once.
    """
    n = gc * grp
    x = x_ref[...].astype(jnp.float32)                     # (N, C, HW) fp32
    xg = x.reshape(gc, grp, c, hw)                         # free: splits leading dim only
    mu = jnp.mean(xg, axis=0, keepdims=True)               # centered form (stable)
    var = jnp.mean(jnp.square(xg - mu), axis=0)            # (grp, C, HW)
    s = jnp.sqrt(var + eps)

    ssum = jnp.sum(s, axis=-1, keepdims=True)              # (grp, C, 1) spatial sums
    # Channel-chunk means without in-kernel minor-dim reshapes (f, cc are small & static).
    chunks = [jnp.sum(ssum[:, j * cc:(j + 1) * cc, :], axis=1, keepdims=True)
              for j in range(f)]                           # each (grp, 1, 1)
    stats = chunks[0] if f == 1 else jnp.concatenate(chunks, axis=1)   # (grp, F, 1)
    stats = stats * (1.0 / (cc * hw))
    # torch's y.repeat(gc, 1, h, w): output row n uses stats[n % grp].
    st = jnp.broadcast_to(stats[None], (gc, grp, f, 1)).reshape(n, f, 1)

    o_ref[:, :c, :] = x.astype(o_ref.dtype)
    o_ref[:, c:, :] = jnp.broadcast_to(st, (n, f, hw)).astype(o_ref.dtype)


def _stats_acc_kernel(x_ref, acc_ref, *, gc, grp, hw, num_tiles, eps):
    """Tiled pass 1: accumulate lane-sums of sqrt(group variance + eps).

    x_ref:   (N, C, T) block  (full batch & channels, one spatial tile)
    acc_ref: (grp, C)  fp32 output block with a constant index map -> stays
             resident in VMEM across the "arbitrary" spatial grid axis and is
             written back to HBM once at the end.
    """
    i = pl.program_id(0)
    c = x_ref.shape[1]
    t = x_ref.shape[-1]

    @pl.when(i == 0)
    def _():
        acc_ref[...] = jnp.zeros_like(acc_ref)

    x = x_ref[...].astype(jnp.float32)                      # fp32 stats
    xg = x.reshape(gc, grp, c, t)                            # free: splits leading dim
    # sum / sum-of-squares over the group axis: ~2x fp32 temporaries instead of
    # ~4x for the centered form -> bigger legal spatial tiles (esp. v7x 64 MiB).
    inv_gc = 1.0 / gc
    mean = jnp.sum(xg, axis=0) * inv_gc                      # (grp, C, T)
    mean_sq = jnp.sum(jnp.square(xg), axis=0) * inv_gc       # (grp, C, T)
    var = jnp.maximum(mean_sq - jnp.square(mean), 0.0)       # guard fp32 cancellation
    s = jnp.sqrt(var + eps)                                  # (grp, C, T)

    rem = hw % t   # static
    if rem == 0:
        acc_ref[...] += jnp.sum(s, axis=-1)
    else:
        # Only the tail tile pays for the mask; it is built at tiny (1, 1, T).
        last = num_tiles - 1

        @pl.when(i != last)
        def _():
            acc_ref[...] += jnp.sum(s, axis=-1)

        @pl.when(i == last)
        def _():
            col = jax.lax.broadcasted_iota(jnp.int32, (1, 1, t), 2)
            acc_ref[...] += jnp.sum(jnp.where(col < rem, s, 0.0), axis=-1)


def _concat_kernel(x_ref, stats_ref, o_ref, *, c):
    """Tiled pass 2: out[:, :C, :] = x ; out[:, C:, :] = lane-broadcast(stats)."""
    x = x_ref[...]                                # (N, C, T)
    st = stats_ref[...]                           # (N, F, 1) fp32, VMEM-resident
    n, f = st.shape[0], st.shape[1]
    t = x.shape[-1]
    o_ref[:, :c, :] = x.astype(o_ref.dtype)
    o_ref[:, c:, :] = jnp.broadcast_to(st, (n, f, t)).astype(o_ref.dtype)


# --------------------------------------------------------------------------- #
# Tiling / budgeting helpers
# --------------------------------------------------------------------------- #

def _vmem_capacity_bytes(default=64 << 20):
    """Physical VMEM of the local chip (64 MiB on v7x, 128 MiB on v5e/v6e)."""
    try:
        info = pltpu.get_tpu_info()
        cap = getattr(info, "vmem_capacity_bytes", None)
        if cap:
            return int(cap)
    except Exception:
        pass
    return default  # conservative (v7x-sized) fallback


def _round_tile(t, hw):
    """Round a user-supplied spatial tile to a multiple of 128 (or to hw)."""
    t = int(t)
    if t >= hw:
        return hw
    return max(128, (t // 128) * 128)


def _pick_spatial_tile(hw, n, c, f, itemsize, budget_bytes):
    """Largest multiple-of-128 spatial tile whose per-step VMEM footprint
    (double-buffered in/out blocks + fp32 temporaries, worst of the two passes)
    fits the budget."""
    pass1_per_col = n * c * (2 * itemsize + 3 * 4)                      # 2x in + fp32 temps
    pass2_per_col = n * c * 2 * itemsize + n * (c + f) * 3 * itemsize   # 2x in + 2x out + cast tmp
    per_col = max(pass1_per_col, pass2_per_col, 1)
    t = budget_bytes // per_col
    if t >= hw:
        return hw
    return max(128, (t // 128) * 128)


# --------------------------------------------------------------------------- #
# Wrapper
# --------------------------------------------------------------------------- #

def minibatch_std_layer(x, channels=1, group_channels=None, epsilon=1e-8,
                        *, spatial_tile=None, fused=None):
    """Pallas TPU forward of MinibatchStdLayer. x: (N, C, H, W) -> (N, C+channels, H, W)."""
    n, c, h, w = x.shape
    gc = int(min(group_channels or n, n))
    if n % gc != 0:
        raise ValueError(f"batch size {n} must be divisible by group size {gc}")
    if c % channels != 0:
        raise ValueError(f"channel count {c} must be divisible by channels={channels}")
    grp = n // gc                 # number of independent statistics rows
    cc = c // channels            # channel-slice depth averaged into each std channel
    f = channels
    hw = h * w

    x3 = x.reshape(n, c, hw)      # free reshape: NCHW is contiguous as (N, C, H*W)
    itemsize = x.dtype.itemsize

    # Generation-aware VMEM budgeting (v7x has 64 MiB physical vs 128 MiB on v5e/v6e).
    cap = _vmem_capacity_bytes()
    budget = min(cap // 2, 56 << 20)                    # combined per-step footprint target
    vmem_limit = int(min(cap - (8 << 20), budget + (8 << 20)))

    # ---- fused single-kernel fast path -------------------------------------------
    # Whole array (+ fp32 temps) resident in VMEM: x read from HBM once.  This is
    # the common case (GAN discriminators run MinibatchStd at 4x4..16x16 spatial).
    fused_bytes = n * hw * (c * itemsize + (c + f) * itemsize + 4 * c * 4
                            + f * (itemsize + 4))
    use_fused = bool(fused) if fused is not None else (fused_bytes <= budget)

    if use_fused:
        out3 = pl.pallas_call(
            functools.partial(_fused_kernel, gc=gc, grp=grp, c=c, f=f, cc=cc,
                              hw=hw, eps=float(epsilon)),
            out_shape=jax.ShapeDtypeStruct((n, c + f, hw), x.dtype),
            grid_spec=pltpu.PrefetchScalarGridSpec(
                num_scalar_prefetch=0,
                grid=(1,),
                in_specs=[pl.BlockSpec((n, c, hw), lambda i: (0, 0, 0))],
                out_specs=pl.BlockSpec((n, c + f, hw), lambda i: (0, 0, 0)),
            ),
            compiler_params=pltpu.CompilerParams(
                dimension_semantics=("arbitrary",),
                vmem_limit_bytes=vmem_limit),
        )(x3)
        return out3.reshape(n, c + f, h, w)

    # ---- tiled two-pass fallback (large H*W) --------------------------------------
    if spatial_tile is not None:
        t = _round_tile(spatial_tile, hw)
    else:
        t = _pick_spatial_tile(hw, n, c, f, itemsize, budget)
    num_tiles = pl.cdiv(hw, t)

    # Pass 1: spatial sums of sqrt(group variance + eps), accumulated in a
    # VMEM-resident (grp, C) output block across the "arbitrary" spatial axis.
    acc = pl.pallas_call(
        functools.partial(_stats_acc_kernel, gc=gc, grp=grp, hw=hw,
                          num_tiles=num_tiles, eps=float(epsilon)),
        out_shape=jax.ShapeDtypeStruct((grp, c), jnp.float32),
        grid_spec=pltpu.PrefetchScalarGridSpec(
            num_scalar_prefetch=0,
            grid=(num_tiles,),
            in_specs=[pl.BlockSpec((n, c, t), lambda i: (0, 0, i))],
            out_specs=pl.BlockSpec((grp, c), lambda i: (0, 0)),
        ),
        compiler_params=pltpu.CompilerParams(
            dimension_semantics=("arbitrary",),
            vmem_limit_bytes=vmem_limit),
    )(x3)

    # Tiny finalization in plain jnp: (grp, C) -> (grp, F) -> (N, F, 1).
    stats = jnp.sum(acc.reshape(grp, f, cc), axis=-1) / (cc * hw)      # (grp, F)
    stats_nf = jnp.tile(stats, (gc, 1)).reshape(n, f, 1)               # row n -> stats[n % grp]

    # Pass 2: stream x into channels [0, C) and lane-broadcast stats into [C, C+F).
    # TODO(synk): on v7x with num_tiles <= 2 a channel-block "parallel" grid axis
    # would let both TensorCores share this pass; small-spatial inputs already take
    # the fused path above, so it is omitted for simplicity.
    out3 = pl.pallas_call(
        functools.partial(_concat_kernel, c=c),
        out_shape=jax.ShapeDtypeStruct((n, c + f, hw), x.dtype),
        grid_spec=pltpu.PrefetchScalarGridSpec(
            num_scalar_prefetch=0,
            grid=(num_tiles,),
            in_specs=[
                pl.BlockSpec((n, c, t), lambda i: (0, 0, i)),
                pl.BlockSpec((n, f, 1), lambda i: (0, 0, 0)),   # resident in VMEM
            ],
            out_specs=pl.BlockSpec((n, c + f, t), lambda i: (0, 0, i)),
        ),
        compiler_params=pltpu.CompilerParams(
            dimension_semantics=("parallel",),
            vmem_limit_bytes=vmem_limit),
    )(x3, stats_nf)

    return out3.reshape(n, c + f, h, w)


def minibatch_std_layer_reference(x, channels=1, group_channels=None, epsilon=1e-8):
    """Pure-JAX mirror of the PyTorch implementation (for verification)."""
    n, c, h, w = x.shape
    gc = int(min(group_channels or n, n))
    cc = c // channels
    y = x.reshape(gc, -1, channels, cc, h, w).astype(jnp.float32)
    y = y - jnp.mean(y, axis=0, keepdims=True)
    y = jnp.sqrt(jnp.mean(jnp.square(y), axis=0) + epsilon)
    y = jnp.mean(y, axis=(2, 3, 4))                       # (N//gc, channels)
    y = y.reshape(-1, channels, 1, 1)
    y = jnp.tile(y, (gc, 1, h, w)).astype(x.dtype)        # row n -> stats[n % (N//gc)]
    return jnp.concatenate([x, y], axis=1)


if __name__ == "__main__":
    key = jax.random.PRNGKey(0)
    k1, k2 = jax.random.split(key)

    # 1) Primary config (layer defaults): fused single-kernel path.
    x = jax.random.normal(k1, (2, 4, 16, 16), dtype=jnp.float32)
    out = minibatch_std_layer(x, channels=1, group_channels=None, epsilon=1e-8)
    out = jax.block_until_ready(out)
    ref = minibatch_std_layer_reference(x, channels=1, group_channels=None, epsilon=1e-8)
    assert out.shape == (2, 5, 16, 16)
    assert out.dtype == x.dtype
    assert jnp.allclose(out, ref, atol=1e-5, rtol=1e-5)

    # 2) Batch grouping + multiple std channels, fused path (f=2, gc=2, grp=2).
    x2 = jax.random.normal(k2, (4, 6, 20, 12), dtype=jnp.float32)
    ref2 = minibatch_std_layer_reference(x2, channels=2, group_channels=2, epsilon=1e-8)
    out2 = minibatch_std_layer(x2, channels=2, group_channels=2, epsilon=1e-8)
    out2 = jax.block_until_ready(out2)
    assert out2.shape == (4, 8, 20, 12)
    assert jnp.allclose(out2, ref2, atol=1e-5, rtol=1e-5)

    # 3) Same config, forced tiled path: exercises the VMEM-resident accumulator
    #    and the masked tail tile (H*W = 240 with a 128-lane tile).
    out3 = minibatch_std_layer(x2, channels=2, group_channels=2, epsilon=1e-8,
                               spatial_tile=128, fused=False)
    out3 = jax.block_until_ready(out3)
    assert jnp.allclose(out3, ref2, atol=1e-5, rtol=1e-5)

    # 4) Tiled path with an exact multiple of 128 (rem == 0 accumulate branch).
    out4 = minibatch_std_layer(x, channels=1, group_channels=None, epsilon=1e-8,
                               spatial_tile=128, fused=False)
    out4 = jax.block_until_ready(out4)
    assert jnp.allclose(out4, ref, atol=1e-5, rtol=1e-5)

    print("KERNEL_OK")
</pallas_src>

<mosaic_0001>
module attributes {stable_mosaic.version = 11 : i64} {
  func.func @_fused_kernel(%arg0: i32, %arg1: memref<2x4x256xf32, #tpu.memory_space<vmem>>, %arg2: memref<2x5x256xf32, #tpu.memory_space<vmem>>) attributes {dimension_semantics = [#tpu.dimension_semantics<arbitrary>], iteration_bounds = array<i64: 1>, scalar_prefetch = 0 : i64, scratch_operands = 0 : i64, tpu.core_type = #tpu.core_type<tc>, window_params = [{pipeline_mode = #tpu.pipeline_mode<synchronous>, transform_indices = @transform_0, window_bounds = array<i64: 2, 4, 256>}, {pipeline_mode = #tpu.pipeline_mode<synchronous>, transform_indices = @transform_1, window_bounds = array<i64: 2, 5, 256>}]} {
    %c0 = arith.constant 0 : index
    %c0_0 = arith.constant 0 : index
    %c0_1 = arith.constant 0 : index
    %0 = vector.load %arg1[%c0, %c0_0, %c0_1] : memref<2x4x256xf32, #tpu.memory_space<vmem>>, vector<2x4x256xf32>
    %1 = vector.shape_cast %0 : vector<2x4x256xf32> to vector<2x1x4x256xf32>
    %cst = arith.constant dense<0.000000e+00> : vector<1x4x256xf32>
    %2 = vector.multi_reduction <add>, %1, %cst [0] : vector<2x1x4x256xf32> to vector<1x4x256xf32>
    %3 = vector.shape_cast %2 : vector<1x4x256xf32> to vector<1x1x4x256xf32>
    %cst_2 = arith.constant 2.000000e+00 : f32
    %4 = vector.broadcast %cst_2 : f32 to vector<1x1x4x256xf32>
    %5 = arith.divf %3, %4 : vector<1x1x4x256xf32>
    %6 = vector.broadcast %5 : vector<1x1x4x256xf32> to vector<2x1x4x256xf32>
    %7 = arith.subf %1, %6 : vector<2x1x4x256xf32>
    %8 = arith.mulf %7, %7 : vector<2x1x4x256xf32>
    %cst_3 = arith.constant dense<0.000000e+00> : vector<1x4x256xf32>
    %9 = vector.multi_reduction <add>, %8, %cst_3 [0] : vector<2x1x4x256xf32> to vector<1x4x256xf32>
    %cst_4 = arith.constant 2.000000e+00 : f32
    %10 = vector.broadcast %cst_4 : f32 to vector<1x4x256xf32>
    %11 = arith.divf %9, %10 : vector<1x4x256xf32>
    %cst_5 = arith.constant 9.99999993E-9 : f32
    %12 = vector.broadcast %cst_5 : f32 to vector<1x4x256xf32>
    %13 = arith.addf %11, %12 : vector<1x4x256xf32>
    %14 = math.sqrt %13 : vector<1x4x256xf32>
    %cst_6 = arith.constant dense<0.000000e+00> : vector<1x4xf32>
    %15 = vector.multi_reduction <add>, %14, %cst_6 [2] : vector<1x4x256xf32> to vector<1x4xf32>
    %16 = vector.shape_cast %15 : vector<1x4xf32> to vector<1x4x1xf32>
    %cst_7 = arith.constant dense<0.000000e+00> : vector<1x1xf32>
    %17 = vector.multi_reduction <add>, %16, %cst_7 [1] : vector<1x4x1xf32> to vector<1x1xf32>
    %18 = vector.shape_cast %17 : vector<1x1xf32> to vector<1x1x1xf32>
    %cst_8 = arith.constant 9.765625E-4 : f32
    %19 = vector.broadcast %cst_8 : f32 to vector<1x1x1xf32>
    %20 = arith.mulf %18, %19 : vector<1x1x1xf32>
    %21 = vector.shape_cast %20 : vector<1x1x1xf32> to vector<1x1x1x1xf32>
    %22 = vector.shape_cast %21 : vector<1x1x1x1xf32> to vector<1x1x1x1xf32>
    %23 = vector.broadcast %22 : vector<1x1x1x1xf32> to vector<2x1x1x1xf32>
    %24 = vector.shape_cast %23 : vector<2x1x1x1xf32> to vector<2x1x1xf32>
    %c0_9 = arith.constant 0 : index
    %c0_10 = arith.constant 0 : index
    %c0_11 = arith.constant 0 : index
    %25 = vector.load %arg2[%c0_9, %c0_10, %c0_11] : memref<2x5x256xf32, #tpu.memory_space<vmem>>, vector<2x4x256xf32>
    tpu.vector_store %arg2[%c0_9, %c0_10, %c0_11], %0 {strides = array<i32>} : memref<2x5x256xf32, #tpu.memory_space<vmem>>, vector<2x4x256xf32>,
    %26 = vector.shape_cast %24 : vector<2x1x1xf32> to vector<2x1x1xf32>
    %27 = vector.broadcast %26 : vector<2x1x1xf32> to vector<2x1x256xf32>
    %c0_12 = arith.constant 0 : index
    %c4 = arith.constant 4 : index
    %c0_13 = arith.constant 0 : index
    %28 = vector.load %arg2[%c0_12, %c4, %c0_13] : memref<2x5x256xf32, #tpu.memory_space<vmem>>, vector<2x1x256xf32>
    tpu.vector_store %arg2[%c0_12, %c4, %c0_13], %27 {strides = array<i32>} : memref<2x5x256xf32, #tpu.memory_space<vmem>>, vector<2x1x256xf32>,
    return
  }
  func.func @transform_0(%arg0: i32) -> (i32, i32, i32) {
    %c0_i32 = arith.constant 0 : i32
    %c0_i32_0 = arith.constant 0 : i32
    %c0_i32_1 = arith.constant 0 : i32
    %c0_i32_2 = arith.constant 0 : i32
    return %c0_i32, %c0_i32_0, %c0_i32_1 : i32, i32, i32
  }
  func.func @transform_1(%arg0: i32) -> (i32, i32, i32) {
    %c0_i32 = arith.constant 0 : i32
    %c0_i32_0 = arith.constant 0 : i32
    %c0_i32_1 = arith.constant 0 : i32
    %c0_i32_2 = arith.constant 0 : i32
    return %c0_i32, %c0_i32_0, %c0_i32_1 : i32, i32, i32
  }
}

</mosaic_0001>

<bundles_post_ra>
// kernel: tpu_custom_call.1
= control target key start
LH: loop header
LB: loop body
LE: loop exit
PB: predicated region body
PF: predicated region fallthrough
CT: control target
= control target key end

     0   :  { %6 = vsyncpa [#allocation3], 0  ;;  %s143_s6 = smov [#allocation2]   ;;  %s188_s0 = inlined_call_operand.hbm [shape: f32[2,4,256], index: 0, kind: input, shape index: {}]   ;;  %s189_s1 = inlined_call_operand.vmem [shape: f32[2,5,256], index: 1, kind: output, shape index: {}]  }
   0x1   :  { %s12_s7 = sshll.u32 %s143_s6, 4  ;;  %s13_s7 = int_to_ptr.vmem [resolvable:$true] %s12_s7 }
   0x2   :  { %s129_s8 = scalar_lea.vmem %s13_s7, 256  ;;  %p134_p1 = scmp.lt.s32.totalorder %s13_s7, %s13_s7 }
   0x3   :  { %p130_p0 = scmp.ne.s32.totalorder %s13_s7, %s129_s8  ;;  %p135_p2 = scmp.lt.s32.totalorder %s129_s8, %s129_s8 }
   0x5   :  { %p136_p3 = por %p135_p2, %p134_p1 }
   0x7   :  { %p137_p4 = pnand %p136_p3, %p130_p0 }
   0x9   :  { %140 = shalt.err (!%p137_p4)
}
   0xa   :  { %s144_s9 = smov 128   ;;  %s145_s10 = smov 8  }
   0xb   :  { %18 = dma.hbm_to_vmem [thread:$0]  %s188_s0, 256, %s13_s7, [#allocation3], %s144_s9, %s144_s9, %s145_s10  }
   0xc   :  { %141 = dma.done.wait [#allocation3], 256  }
   0xd   :  { %142 = vsyncadd [#allocation3], 4294967040  ;;  %vm30_vm0 = vcmask 1043456   ;;  %v22_v0 = vld [vmem:[#allocation2] sm:$0xff]  ;;  %v23_v1 = vld [vmem:[#allocation2 + $0x8] sm:$0xff]  ;;  %v95_v48 = vlaneseq }
   0xe   :  { %v26_v2 = vcombine.high %v22_v0, %v22_v0  ;;  %v27_v3 = vcombine.high %v23_v1, %v23_v1  ;;  %v31_v4 = vsel %vm30_vm0, %v22_v0, 0.0  ;;  %v32_v5 = vsel %vm30_vm0, %v23_v1, 0.0  ;;  %91 = vst [vmem:[%s189_s1] sm:$0xf] %v22_v0  ;;  %93 = vst [vmem:[%s189_s1 + $0x10] sm:$0xf] %v23_v1 }
   0xf   :  { %v33_v6 = vadd.f32 %v32_v5, %v31_v4  ;;  %vm97_vm5 = vcmp.lt.s32.totalorder %v95_v48, 256 }
  0x10   :  { %v34_v7 = vsel %vm30_vm0, %v26_v2, 0.0  ;;  %v35_v8 = vsel %vm30_vm0, %v27_v3, 0.0  ;;  %92 = vst [vmem:[%s189_s1 + $0x8] sm:$0xf] %v26_v2  ;;  %94 = vst [vmem:[%s189_s1 + $0x18] sm:$0xf] %v27_v3 }
  0x11   :  { %v36_v9 = vadd.f32 %v35_v8, %v34_v7  ;;  %v38_v10 = vmul.f32 0.5, %v33_v6 }
  0x13   :  { %v39_v11 = vmul.f32 0.5, %v36_v9 }
  0x15   :  { %v42_v12 = vcombine.low %v38_v10, %v39_v11 }
  0x17   :  { %v44_v13 = vsub.f32 %v22_v0, %v42_v12  ;;  %v45_v14 = vsub.f32 %v23_v1, %v42_v12 }
  0x19   :  { %v46_v15 = vmul.f32 %v44_v13, %v44_v13  ;;  %v47_v16 = vmul.f32 %v45_v14, %v45_v14 }
  0x1b   :  { %v50_v17 = vcombine.high %v46_v15, %v46_v15  ;;  %v51_v18 = vcombine.high %v47_v16, %v47_v16  ;;  %v54_v19 = vsel %vm30_vm0, %v46_v15, 0.0  ;;  %v55_v20 = vsel %vm30_vm0, %v47_v16, 0.0 }
  0x1c   :  { %v56_v21 = vadd.f32 %v55_v20, %v54_v19 }
  0x1d   :  { %v57_v22 = vsel %vm30_vm0, %v50_v17, 0.0  ;;  %v58_v23 = vsel %vm30_vm0, %v51_v18, 0.0 }
  0x1e   :  { %v59_v24 = vadd.f32 %v58_v23, %v57_v22  ;;  %v60_v25 = vmul.f32 0.5, %v56_v21 }
  0x20   :  { %v61_v26 = vmul.f32 0.5, %v59_v24  ;;  %v62_v27 = vadd.f32 1e-08, %v60_v25 }
  0x22   :  { %v63_v28 = vadd.f32 1e-08, %v61_v26  ;;  %117 = vrsqrt.f32 %v62_v27  ;;  %vm66_vm1 = vcmp.eq.f32.partialorder %v62_v27, inf  ;;  %v69_v30 = vand.u32 2147483648, %v62_v27 }
  0x23   :  { %vm68_vm2 = vcmp.eq.f32.partialorder %v62_v27, 0.0 }
  0x24   :  { %119 = vrsqrt.f32 %v63_v28  ;;  %vm73_vm3 = vcmp.eq.f32.partialorder %v63_v28, inf  ;;  %v76_v33 = vand.u32 2147483648, %v63_v28  ;;  %vm75_vm4 = vcmp.eq.f32.partialorder %v63_v28, 0.0 }
  0x2f   :  { %v118_v29 = vpop.eup %117 }
  0x30   :  { %v65_v31 = vmul.f32 %v118_v29, %v62_v27 }
  0x31   :  { %v120_v32 = vpop.eup %119 }
  0x32   :  { %v67_v34 = vsel %vm66_vm1, %v62_v27, %v65_v31  ;;  %v72_v35 = vmul.f32 %v120_v32, %v63_v28 }
  0x33   :  { %v70_v36 = vsel %vm68_vm2, %v69_v30, %v67_v34 }
  0x34   :  { %v74_v37 = vsel %vm73_vm3, %v63_v28, %v72_v35  ;;  %v78_v38 = vsel %vm30_vm0, %v70_v36, 0.0 }
  0x35   :  { %v77_v39 = vsel %vm75_vm4, %v76_v33, %v74_v37 }
  0x36   :  { %v79_v40 = vsel %vm30_vm0, %v77_v39, 0.0 }
  0x37   :  { %v80_v41 = vadd.f32 %v79_v40, %v78_v38 }
  0x39   :  { %81 = vadd.xlane.f32.xlu0 %v80_v41 }
  0xc2   :  { %v82_v42 = vpop.xlane.xlu0 %81 }
  0xc3   :  { %v83_v43 = vsel %vm30_vm0, %v82_v42, 0.0 }
  0xc4   :  { %v84_v44 = vrot.slane %v83_v43, 4 }
  0xc6   :  { %v85_v45 = vadd.f32 %v84_v44, %v83_v43 }
  0xc8   :  { %v86_v46 = vrot.slane %v85_v45, 2 }
  0xca   :  { %v87_v47 = vadd.f32 %v86_v46, %v85_v45 }
  0xcc   :  { %v88_v49 = vrot.slane %v87_v47, 1 }
  0xce   :  { %v89_v50 = vadd.f32 %v88_v49, %v87_v47 }
  0xd0   :  { %v90_v51 = vmul.f32 0.0009765625, %v89_v50 }
  0xd2   :  { %110 = vst.msk [vmem:[%s189_s1 + $0x4] ss:$8 sm:$0x3] %vm97_vm5, %v90_v51  ;;  %111 = vst.msk [vmem:[%s189_s1 + $0x14] ss:$8 sm:$0x3] %vm97_vm5, %v90_v51 }
  0xd3   :  { %109 = vsyncpa [#allocation3], 1 }

</bundles_post_ra>
